<compile_context>
chip_gen: v6e
topology: v6e:2x2x1
jax: 0.10.0
libtpu: 0.0.40
codegen_flags: <defaults>
</compile_context>

<pallas_src>
import functools

import jax
import jax.numpy as jnp
from jax import lax
from jax.experimental import pallas as pl
from jax.experimental.pallas import tpu as pltpu

GAMMA = 2.0
IGNORE_INDEX = -1


def _round_up(x, m):
    return (x + m - 1) // m * m


def _focal_loss_kernel(logits_ref, targets_ref, alpha_ref, out_ref,
                       total_ref, count_ref, *, gamma, ignore_index):
    # logits_ref: (C, TN) native dtype | targets_ref: (1, TN) int32
    # alpha_ref:  (C, 1)  f32          | out_ref:     (1, 1)  f32
    # total_ref / count_ref: (1, 1) f32 VMEM accumulators, resident across grid.
    i = pl.program_id(0)

    @pl.when(i == 0)
    def _init():
        total_ref[...] = jnp.zeros_like(total_ref)
        count_ref[...] = jnp.zeros_like(count_ref)

    x = logits_ref[...].astype(jnp.float32)        # (C, TN)
    t = targets_ref[...]                           # (1, TN)
    alpha = alpha_ref[...].astype(jnp.float32)     # (C, 1)

    # log-softmax over the class axis (sublanes); batch stays lane-dense.
    m = jnp.max(x, axis=0, keepdims=True)          # (1, TN)
    z = x - m
    lse = jnp.log(jnp.sum(jnp.exp(z), axis=0, keepdims=True))
    logp = z - lse                                 # (C, TN)

    # Fused one-hot gather: ce = -alpha[t] * logp[t].  Ignored / padded columns
    # (t == ignore_index) match no class -> ce == 0 -> focal == 0, so no extra
    # masking of the loss itself is needed.
    cls = lax.broadcasted_iota(jnp.int32, x.shape, 0)          # (C, TN)
    onehot = cls == t
    ce = -jnp.sum(jnp.where(onehot, alpha * logp, 0.0),
                  axis=0, keepdims=True)                       # (1, TN)

    pt = jnp.exp(-ce)
    base = 1.0 - pt
    g = float(gamma)
    if g == float(int(g)) and int(g) >= 1:
        # Integer gamma: repeated VALU multiplies instead of an EUP pow.
        w = base
        for _ in range(int(g) - 1):
            w = w * base
    elif g == 0.0:
        w = jnp.ones_like(base)
    else:
        w = jnp.power(base, g)
    focal = w * ce                                 # (1, TN)

    valid = (t != ignore_index).astype(jnp.float32)

    total_ref[...] += jnp.sum(focal, keepdims=True)
    count_ref[...] += jnp.sum(valid, keepdims=True)

    @pl.when(i == pl.num_programs(0) - 1)
    def _finalize():
        # NaN if every element is ignored -- same behaviour as the reference.
        out_ref[...] = total_ref[...] / count_ref[...]


def focal_loss(logits, targets, alpha=None, *, gamma=GAMMA,
               ignore_index=IGNORE_INDEX, block_n=2048):
    """logits: (N, C); targets: (N,) int (ignore_index == ignored); alpha: (C,) or None.
    Returns the scalar mean focal loss over the non-ignored elements."""
    n, c = logits.shape
    if alpha is None:
        alpha = jnp.ones((c,), jnp.float32)

    # Batch-on-lanes layout.
    x_t = jnp.transpose(logits)                        # (C, N), native dtype
    t_row = targets.reshape(1, n).astype(jnp.int32)    # (1, N)
    a_col = alpha.reshape(c, 1).astype(jnp.float32)    # (C, 1)

    # Tile the lane (batch) axis.  Cap the per-buffer logits tile at ~4 MiB so a
    # double-buffered pipeline fits every generation's scoped-VMEM default.
    itemsize = jnp.dtype(logits.dtype).itemsize
    max_tn_vmem = max(128, ((4 * 1024 * 1024) // max(c * itemsize, 1)) // 128 * 128)
    tn = max(128, min(block_n, max_tn_vmem, _round_up(n, 128)))
    padded_n = _round_up(n, tn)
    if padded_n != n:
        pad = padded_n - n
        x_t = jnp.pad(x_t, ((0, 0), (0, pad)))
        t_row = jnp.pad(t_row, ((0, 0), (0, pad)), constant_values=ignore_index)

    grid = (padded_n // tn,)
    kernel = functools.partial(_focal_loss_kernel, gamma=gamma,
                               ignore_index=ignore_index)

    # Single reduction ("arbitrary") axis keeps the accumulator pattern simple;
    # a v7x dual-TensorCore split would add a leading "parallel" axis producing
    # per-core partials combined in the wrapper.
    out = pl.pallas_call(
        kernel,
        out_shape=jax.ShapeDtypeStruct((1, 1), jnp.float32),
        grid=grid,
        in_specs=[
            pl.BlockSpec((c, tn), lambda i: (0, i)),   # logits (C, TN)
            pl.BlockSpec((1, tn), lambda i: (0, i)),   # targets (1, TN)
            pl.BlockSpec((c, 1), lambda i: (0, 0)),    # alpha (C, 1)
        ],
        out_specs=pl.BlockSpec((1, 1), lambda i: (0, 0)),
        scratch_shapes=[
            pltpu.VMEM((1, 1), jnp.float32),           # running total
            pltpu.VMEM((1, 1), jnp.float32),           # running valid count
        ],
        compiler_params=pltpu.CompilerParams(
            dimension_semantics=("arbitrary",)),
    )(x_t, t_row, a_col)
    return out[0, 0]


def _reference(logits, targets, alpha, gamma=GAMMA, ignore_index=IGNORE_INDEX):
    # pure-JAX reference mirroring torch.nn.functional.cross_entropy semantics
    logp = jax.nn.log_softmax(logits.astype(jnp.float32), axis=-1)
    valid = targets != ignore_index
    safe_t = jnp.where(valid, targets, 0)
    logp_t = jnp.take_along_axis(logp, safe_t[:, None], axis=-1)[:, 0]
    alpha_t = alpha[safe_t]
    ce = jnp.where(valid, -alpha_t * logp_t, 0.0)
    pt = jnp.exp(-ce)
    focal = (1.0 - pt) ** gamma * ce
    return jnp.sum(jnp.where(valid, focal, 0.0)) / jnp.sum(valid.astype(jnp.float32))


if __name__ == "__main__":
    key = jax.random.PRNGKey(0)
    k1, k2, k3, k4 = jax.random.split(key, 4)

    # Small case (single tile after padding to 128 lanes): 64 samples, 8 classes.
    N, C = 64, 8
    logits = jax.random.normal(k1, (N, C), dtype=jnp.float32)
    targets = jax.random.randint(k2, (N,), 0, C, dtype=jnp.int32)
    targets = targets.at[::7].set(IGNORE_INDEX)          # some ignored samples
    alpha = 0.5 + 0.1 * jnp.arange(C, dtype=jnp.float32)  # per-class weights

    loss = jax.block_until_ready(focal_loss(logits, targets, alpha))
    ref = _reference(logits, targets, alpha)
    assert jnp.allclose(loss, ref, atol=1e-5, rtol=1e-5), (loss, ref)

    # Multi-tile + padding case: N not a multiple of the 128-lane tile, grid > 1.
    N2, C2 = 300, 8
    logits2 = jax.random.normal(k3, (N2, C2), dtype=jnp.float32)
    targets2 = jax.random.randint(k4, (N2,), 0, C2, dtype=jnp.int32)
    targets2 = targets2.at[::5].set(IGNORE_INDEX)
    alpha2 = jnp.linspace(0.5, 1.5, C2, dtype=jnp.float32)

    loss2 = jax.block_until_ready(focal_loss(logits2, targets2, alpha2, block_n=128))
    ref2 = _reference(logits2, targets2, alpha2)
    assert jnp.allclose(loss2, ref2, atol=1e-5, rtol=1e-5), (loss2, ref2)

    print("KERNEL_OK")
</pallas_src>

<mosaic_0001>
module attributes {stable_mosaic.version = 11 : i64} {
  func.func @_focal_loss_kernel(%arg0: i32, %arg1: memref<8x128xf32, #tpu.memory_space<vmem>>, %arg2: memref<1x128xi32, #tpu.memory_space<vmem>>, %arg3: memref<8x1xf32, #tpu.memory_space<vmem>>, %arg4: memref<1x1xf32, #tpu.memory_space<vmem>>, %arg5: memref<1x1xf32, #tpu.memory_space<vmem>>, %arg6: memref<1x1xf32, #tpu.memory_space<vmem>>) attributes {dimension_semantics = [#tpu.dimension_semantics<arbitrary>], iteration_bounds = array<i64: 1>, scalar_prefetch = 0 : i64, scratch_operands = 2 : i64, tpu.core_type = #tpu.core_type<tc>, window_params = [{transform_indices = @transform_0, window_bounds = array<i64: 8, 128>}, {transform_indices = @transform_1, window_bounds = array<i64: 1, 128>}, {pipeline_mode = #tpu.pipeline_mode<synchronous>, transform_indices = @transform_2, window_bounds = array<i64: 8, 1>}, {pipeline_mode = #tpu.pipeline_mode<synchronous>, transform_indices = @transform_3, window_bounds = array<i64: 1, 1>}]} {
    %c0_i32 = arith.constant 0 : i32
    %0 = arith.cmpi eq, %arg0, %c0_i32 : i32
    %1 = arith.extui %0 : i1 to i32
    %c0_i32_0 = arith.constant 0 : i32
    %2 = arith.cmpi ne, %1, %c0_i32_0 : i32
    scf.if %2 {
      %cst_24 = arith.constant 0.000000e+00 : f32
      %57 = vector.broadcast %cst_24 : f32 to vector<1x1xf32>
      %c0_25 = arith.constant 0 : index
      %c0_26 = arith.constant 0 : index
      %58 = vector.load %arg5[%c0_25, %c0_26] : memref<1x1xf32, #tpu.memory_space<vmem>>, vector<1x1xf32>
      tpu.vector_store %arg5[%c0_25, %c0_26], %57 {strides = array<i32>} : memref<1x1xf32, #tpu.memory_space<vmem>>, vector<1x1xf32>,
      %cst_27 = arith.constant 0.000000e+00 : f32
      %59 = vector.broadcast %cst_27 : f32 to vector<1x1xf32>
      %c0_28 = arith.constant 0 : index
      %c0_29 = arith.constant 0 : index
      %60 = vector.load %arg6[%c0_28, %c0_29] : memref<1x1xf32, #tpu.memory_space<vmem>>, vector<1x1xf32>
      tpu.vector_store %arg6[%c0_28, %c0_29], %59 {strides = array<i32>} : memref<1x1xf32, #tpu.memory_space<vmem>>, vector<1x1xf32>,
    } else {
    }
    %c0 = arith.constant 0 : index
    %c0_1 = arith.constant 0 : index
    %3 = vector.load %arg1[%c0, %c0_1] : memref<8x128xf32, #tpu.memory_space<vmem>>, vector<8x128xf32>
    %c0_2 = arith.constant 0 : index
    %c0_3 = arith.constant 0 : index
    %4 = vector.load %arg2[%c0_2, %c0_3] : memref<1x128xi32, #tpu.memory_space<vmem>>, vector<1x128xi32>
    %c0_4 = arith.constant 0 : index
    %c0_5 = arith.constant 0 : index
    %5 = vector.load %arg3[%c0_4, %c0_5] : memref<8x1xf32, #tpu.memory_space<vmem>>, vector<8x1xf32>
    %cst = arith.constant dense<0xFF800000> : vector<128xf32>
    %6 = vector.multi_reduction <maximumf>, %3, %cst [0] : vector<8x128xf32> to vector<128xf32>
    %7 = vector.shape_cast %6 : vector<128xf32> to vector<1x128xf32>
    %8 = vector.broadcast %7 : vector<1x128xf32> to vector<8x128xf32>
    %9 = arith.subf %3, %8 : vector<8x128xf32>
    %10 = math.exp %9 : vector<8x128xf32>
    %cst_6 = arith.constant dense<0.000000e+00> : vector<128xf32>
    %11 = vector.multi_reduction <add>, %10, %cst_6 [0] : vector<8x128xf32> to vector<128xf32>
    %12 = vector.shape_cast %11 : vector<128xf32> to vector<1x128xf32>
    %13 = math.log %12 : vector<1x128xf32>
    %14 = vector.broadcast %13 : vector<1x128xf32> to vector<8x128xf32>
    %15 = arith.subf %9, %14 : vector<8x128xf32>
    %16 = tpu.iota {dimensions = array<i32: 0>} : vector<8x128xi32>
    %17 = vector.broadcast %4 : vector<1x128xi32> to vector<8x128xi32>
    %18 = arith.cmpi eq, %16, %17 : vector<8x128xi32>
    %19 = vector.broadcast %5 : vector<8x1xf32> to vector<8x128xf32>
    %20 = arith.mulf %19, %15 : vector<8x128xf32>
    %cst_7 = arith.constant 0.000000e+00 : f32
    %21 = vector.broadcast %cst_7 : f32 to vector<8x128xf32>
    %22 = arith.select %18, %20, %21 : vector<8x128xi1>, vector<8x128xf32>
    %cst_8 = arith.constant dense<0.000000e+00> : vector<128xf32>
    %23 = vector.multi_reduction <add>, %22, %cst_8 [0] : vector<8x128xf32> to vector<128xf32>
    %24 = vector.shape_cast %23 : vector<128xf32> to vector<1x128xf32>
    %cst_9 = arith.constant 0.000000e+00 : f32
    %25 = vector.broadcast %cst_9 : f32 to vector<1x128xf32>
    %26 = arith.subf %25, %24 : vector<1x128xf32>
    %cst_10 = arith.constant 0.000000e+00 : f32
    %27 = vector.broadcast %cst_10 : f32 to vector<1x128xf32>
    %28 = arith.subf %27, %26 : vector<1x128xf32>
    %29 = math.exp %28 : vector<1x128xf32>
    %cst_11 = arith.constant 1.000000e+00 : f32
    %30 = vector.broadcast %cst_11 : f32 to vector<1x128xf32>
    %31 = arith.subf %30, %29 : vector<1x128xf32>
    %32 = arith.mulf %31, %31 : vector<1x128xf32>
    %33 = arith.mulf %32, %26 : vector<1x128xf32>
    %c-1_i32 = arith.constant -1 : i32
    %34 = vector.broadcast %c-1_i32 : i32 to vector<1x128xi32>
    %35 = arith.cmpi ne, %4, %34 : vector<1x128xi32>
    %36 = arith.extui %35 : vector<1x128xi1> to vector<1x128xi32>
    %37 = arith.sitofp %36 : vector<1x128xi32> to vector<1x128xf32>
    %c0_12 = arith.constant 0 : index
    %c0_13 = arith.constant 0 : index
    %38 = vector.load %arg5[%c0_12, %c0_13] : memref<1x1xf32, #tpu.memory_space<vmem>>, vector<1x1xf32>
    %39 = vector.shape_cast %33 : vector<1x128xf32> to vector<1x1x128xf32>
    %cst_14 = arith.constant dense<0.000000e+00> : vector<1xf32>
    %40 = vector.multi_reduction <add>, %39, %cst_14 [1, 2] : vector<1x1x128xf32> to vector<1xf32>
    %41 = vector.shape_cast %40 : vector<1xf32> to vector<1x1x1xf32>
    %42 = vector.extract %41[0, 0, 0] : f32 from vector<1x1x1xf32>
    %43 = vector.broadcast %42 : f32 to vector<1x1xf32>
    %44 = arith.addf %38, %43 : vector<1x1xf32>
    %c0_15 = arith.constant 0 : index
    %c0_16 = arith.constant 0 : index
    %45 = vector.load %arg5[%c0_15, %c0_16] : memref<1x1xf32, #tpu.memory_space<vmem>>, vector<1x1xf32>
    tpu.vector_store %arg5[%c0_15, %c0_16], %44 {strides = array<i32>} : memref<1x1xf32, #tpu.memory_space<vmem>>, vector<1x1xf32>,
    %c0_17 = arith.constant 0 : index
    %c0_18 = arith.constant 0 : index
    %46 = vector.load %arg6[%c0_17, %c0_18] : memref<1x1xf32, #tpu.memory_space<vmem>>, vector<1x1xf32>
    %47 = vector.shape_cast %37 : vector<1x128xf32> to vector<1x1x128xf32>
    %cst_19 = arith.constant dense<0.000000e+00> : vector<1xf32>
    %48 = vector.multi_reduction <add>, %47, %cst_19 [1, 2] : vector<1x1x128xf32> to vector<1xf32>
    %49 = vector.shape_cast %48 : vector<1xf32> to vector<1x1x1xf32>
    %50 = vector.extract %49[0, 0, 0] : f32 from vector<1x1x1xf32>
    %51 = vector.broadcast %50 : f32 to vector<1x1xf32>
    %52 = arith.addf %46, %51 : vector<1x1xf32>
    %c0_20 = arith.constant 0 : index
    %c0_21 = arith.constant 0 : index
    %53 = vector.load %arg6[%c0_20, %c0_21] : memref<1x1xf32, #tpu.memory_space<vmem>>, vector<1x1xf32>
    tpu.vector_store %arg6[%c0_20, %c0_21], %52 {strides = array<i32>} : memref<1x1xf32, #tpu.memory_space<vmem>>, vector<1x1xf32>,
    %c0_i32_22 = arith.constant 0 : i32
    %54 = arith.cmpi eq, %arg0, %c0_i32_22 : i32
    %55 = arith.extui %54 : i1 to i32
    %c0_i32_23 = arith.constant 0 : i32
    %56 = arith.cmpi ne, %55, %c0_i32_23 : i32
    scf.if %56 {
      %c0_24 = arith.constant 0 : index
      %c0_25 = arith.constant 0 : index
      %57 = vector.load %arg5[%c0_24, %c0_25] : memref<1x1xf32, #tpu.memory_space<vmem>>, vector<1x1xf32>
      %c0_26 = arith.constant 0 : index
      %c0_27 = arith.constant 0 : index
      %58 = vector.load %arg6[%c0_26, %c0_27] : memref<1x1xf32, #tpu.memory_space<vmem>>, vector<1x1xf32>
      %59 = arith.divf %57, %58 : vector<1x1xf32>
      %c0_28 = arith.constant 0 : index
      %c0_29 = arith.constant 0 : index
      %60 = vector.load %arg4[%c0_28, %c0_29] : memref<1x1xf32, #tpu.memory_space<vmem>>, vector<1x1xf32>
      tpu.vector_store %arg4[%c0_28, %c0_29], %59 {strides = array<i32>} : memref<1x1xf32, #tpu.memory_space<vmem>>, vector<1x1xf32>,
    } else {
    }
    return
  }
  func.func @transform_0(%arg0: i32) -> (i32, i32) {
    %c0_i32 = arith.constant 0 : i32
    %c0_i32_0 = arith.constant 0 : i32
    return %c0_i32, %arg0 : i32, i32
  }
  func.func @transform_1(%arg0: i32) -> (i32, i32) {
    %c0_i32 = arith.constant 0 : i32
    %c0_i32_0 = arith.constant 0 : i32
    return %c0_i32, %arg0 : i32, i32
  }
  func.func @transform_2(%arg0: i32) -> (i32, i32) {
    %c0_i32 = arith.constant 0 : i32
    %c0_i32_0 = arith.constant 0 : i32
    %c0_i32_1 = arith.constant 0 : i32
    return %c0_i32, %c0_i32_0 : i32, i32
  }
  func.func @transform_3(%arg0: i32) -> (i32, i32) {
    %c0_i32 = arith.constant 0 : i32
    %c0_i32_0 = arith.constant 0 : i32
    %c0_i32_1 = arith.constant 0 : i32
    return %c0_i32, %c0_i32_0 : i32, i32
  }
}

</mosaic_0001>

<bundles_post_ra>
// kernel: tpu_custom_call.1
= control target key start
LH: loop header
LB: loop body
LE: loop exit
PB: predicated region body
PF: predicated region fallthrough
CT: control target
= control target key end

     0   :  { %v164_v1 = vmov 0   ;;  %s206_s0 = inlined_call_operand.vmem [shape: f32[8,128], index: 0, kind: input, shape index: {}]   ;;  %s207_s1 = inlined_call_operand.vmem [shape: s32[1,128], index: 1, kind: input, shape index: {}]   ;;  %s208_s2 = inlined_call_operand.vmem [shape: f32[8,1], index: 2, kind: input, shape index: {}]   ;;  %s209_s3 = inlined_call_operand.hbm [shape: f32[1,1], index: 3, kind: output, shape index: {}]  }
   0x1   :  { %v24_v0 = vld [vmem:[%s208_s2] sm:$0xff]  ;;  %133 = vset.pattern.permute.xlu0 %v164_v1 }
   0x2   :  { %8 = vsyncpa [#allocation5], 0  ;;  %52 = vperm.xlu0 %133, %v24_v0   ;;  %v23_v2 = vld [vmem:[%s207_s1] sm:$0x1]  ;;  %vm74_vm1 = vcmask 1040384   ;;  %v165_v3 = vmov 0.0   ;;  %v43_v22 = vlaneseq }
   0x3   :  { %vm70_vm0 = vcmp.ne.s32.totalorder %v23_v2, 4294967295  ;;  %vm19_vm2 = vcmask 0   ;;  %v22_v6 = vld [vmem:[%s206_s0] sm:$0xff]  ;;  %s166_s17 = smov [#allocation4]  }
   0x4   :  { %v125_v4 = vsel %vm70_vm0, 1.0, %v165_v3  ;;  %20 = vst.msk [vmem:[#allocation2] sm:$0x1] %vm19_vm2, %v165_v3  ;;  %21 = vst.msk [vmem:[#allocation3] sm:$0x1] %vm19_vm2, %v165_v3  ;;  %v25_v7 = vrot.slane %v22_v6, 4 }
   0x5   :  { %v90_v5 = vsel %vm74_vm1, %v125_v4, 0.0  ;;  %v44_v23 = vshrl.u32 %v43_v22, 7  ;;  %s117_s18 = sshll.u32 %s166_s17, 4  ;;  %s118_s18 = int_to_ptr.vmem [resolvable:$true] %s117_s18 }
   0x6   :  { %91 = vadd.xlane.f32.xlu1 %v90_v5  ;;  %v26_v8 = vmax.f32 %v22_v6, %v25_v7  ;;  %s142_s19 = scalar_lea.vmem %s118_s18, 16  ;;  %s146_s20 = scalar_lea.vmem %s118_s18, 32 }
   0x7   :  { %v47_v25 = vsub.s32 0, %v44_v23  ;;  %p143_p0 = scmp.ne.s32.totalorder %s118_s18, %s142_s19  ;;  %p147_p1 = scmp.lt.s32.totalorder %s118_s18, %s118_s18 }
   0x8   :  { %v27_v9 = vrot.slane %v26_v8, 2  ;;  %p148_p2 = scmp.lt.s32.totalorder %s146_s20, %s142_s19 }
   0x9   :  { %v48_v27 = vrot.slane %v23_v2, %v47_v25 }
   0xa   :  { %v28_v10 = vmax.f32 %v26_v8, %v27_v9  ;;  %p149_p3 = por %p148_p2, %p147_p1 }
   0xb   :  { %vm49_vm3 = vcmp.eq.s32.totalorder %v44_v23, %v48_v27  ;;  %v73_v60 = vld [vmem:[#allocation2] sm:$0x1]  ;;  %v89_v61 = vld [vmem:[#allocation3] sm:$0x1] }
   0xc   :  { %v29_v11 = vrot.slane %v28_v10, 1  ;;  %p150_p4 = pnand %p149_p3, %p143_p0 }
   0xe   :  { %v30_v12 = vmax.f32 %v28_v10, %v29_v11 }
  0x10   :  { %v31_v13 = vsub.f32 %v22_v6, %v30_v12 }
  0x12   :  { %v32_v14 = vmul.f32 1.442695, %v31_v13 }
  0x14   :  { %134 = vpow2.f32 %v32_v14 }
  0x21   :  { %v135_v15 = vpop.eup %134 }
  0x22   :  { %v34_v16 = vrot.slane %v135_v15, 4 }
  0x24   :  { %v35_v17 = vadd.f32 %v135_v15, %v34_v16 }
  0x26   :  { %v36_v18 = vrot.slane %v35_v17, 2 }
  0x28   :  { %v37_v19 = vadd.f32 %v36_v18, %v35_v17 }
  0x2a   :  { %v38_v20 = vrot.slane %v37_v19, 1 }
  0x2c   :  { %v39_v21 = vadd.f32 %v38_v20, %v37_v19 }
  0x2e   :  { %136 = vlog2.f32 %v39_v21 }
  0x3b   :  { %v137_v24 = vpop.eup %136 }
  0x3c   :  { %v41_v26 = vmul.f32 0.6931472, %v137_v24 }
  0x3e   :  { %v42_v28 = vsub.f32 %v31_v13, %v41_v26 }
  0x7d   :  { %v53_v29 = vpop.permute.xlu0 %52 }
  0x7e   :  { %v55_v30 = vmul.f32 %v53_v29, %v42_v28 }
  0x80   :  { %v56_v31 = vsel %vm49_vm3, %v55_v30, 0.0 }
  0x81   :  { %v57_v32 = vrot.slane %v56_v31, 4 }
  0x83   :  { %v58_v33 = vadd.f32 %v57_v32, %v56_v31 }
  0x85   :  { %v59_v34 = vrot.slane %v58_v33, 2 }
  0x87   :  { %v60_v35 = vadd.f32 %v59_v34, %v58_v33 }
  0x89   :  { %v61_v36 = vrot.slane %v60_v35, 1 }
  0x8b   :  { %v62_v37 = vadd.f32 %v61_v36, %v60_v35 }
  0x8d   :  { %v63_v38 = vsub.f32 0.0, %v62_v37 }
  0x8f   :  { %v64_v39 = vsub.f32 0.0, %v63_v38  ;;  %v92_v46 = vpop.xlane.xlu1 %91 }
  0x90   :  { %v93_v47 = vrot.slane %v92_v46, 4 }
  0x91   :  { %v65_v40 = vmul.f32 1.442695, %v64_v39 }
  0x92   :  { %v94_v48 = vadd.f32 %v93_v47, %v92_v46 }
  0x93   :  { %138 = vpow2.f32 %v65_v40 }
  0x94   :  { %v95_v49 = vrot.slane %v94_v48, 2 }
  0x96   :  { %v96_v53 = vadd.f32 %v95_v49, %v94_v48 }
  0x98   :  { %v97_v56 = vrot.slane %v96_v53, 1 }
  0x9a   :  { %v98_v59 = vadd.f32 %v97_v56, %v96_v53 }
  0xa0   :  { %v139_v41 = vpop.eup %138 }
  0xa1   :  { %v67_v42 = vsub.f32 1.0, %v139_v41 }
  0xa3   :  { %v68_v43 = vmul.f32 %v67_v42, %v67_v42 }
  0xa5   :  { %v69_v44 = vmul.f32 %v68_v43, %v63_v38 }
  0xa7   :  { %v75_v45 = vsel %vm74_vm1, %v69_v44, 0.0 }
  0xa8   :  { %76 = vadd.xlane.f32.xlu0 %v75_v45 }
 0x131   :  { %v77_v50 = vpop.xlane.xlu0 %76 }
 0x132   :  { %v78_v51 = vrot.slane %v77_v50, 4 }
 0x134   :  { %v79_v52 = vadd.f32 %v78_v51, %v77_v50 }
 0x136   :  { %v80_v54 = vrot.slane %v79_v52, 2 }
 0x138   :  { %v81_v55 = vadd.f32 %v80_v54, %v79_v52 }
 0x13a   :  { %v82_v57 = vrot.slane %v81_v55, 1 }
 0x13c   :  { %v83_v58 = vadd.f32 %v82_v57, %v81_v55 }
 0x13e   :  { %126 = vpush %v83_v58 }
 0x13f   :  { %128 = vpush %v98_v59 }
 0x16f   :  { %s127_s0 = spop %126 }
 0x170   :  { %v85_v62 = vstv %s127_s0  ;;  %s129_s1 = spop %128 }
 0x171   :  { %v86_v63 = vadd.f32 %v85_v62, %v73_v60  ;;  %v100_v0 = vstv %s129_s1 }
 0x172   :  { %v101_v1 = vadd.f32 %v100_v0, %v89_v61 }
 0x173   :  { %88 = vst.msk [vmem:[#allocation2] sm:$0x1] %vm19_vm2, %v86_v63 }
 0x174   :  { %102 = vst.msk [vmem:[#allocation3] sm:$0x1] %vm19_vm2, %v101_v1 }
 0x17a   :  { %v106_v4 = vld [vmem:[#allocation2] sm:$0x1] }
 0x17b   :  { %v107_v2 = vld [vmem:[#allocation3] sm:$0x1] }
 0x17c   :  { %140 = vrcp.f32 %v107_v2 }
 0x189   :  { %v141_v3 = vpop.eup %140 }
 0x18a   :  { %v109_v5 = vmul.f32 %v141_v3, %v106_v4 }
 0x18c   :  { %110 = vst.msk [vmem:[#allocation4] sm:$0x1] %vm19_vm2, %v109_v5 }
 0x18d   :  { %153 = shalt.err (!%p150_p4)
}
 0x18e   :  { %120 = dma.vmem_to_hbm [thread:$0]  %s118_s18, 16, %s209_s3, [#allocation5]  }
 0x18f   :  { %162 = dma.done.wait [#allocation5], 16  }
 0x190   :  { %163 = vsyncadd [#allocation5], 4294967280 }
 0x191   :  { %124 = vsyncpa [#allocation5], 1 }

</bundles_post_ra>
